<compile_context>
chip_gen: v5e
topology: v5e:2x2
jax: 0.10.0
libtpu: 0.0.40
codegen_flags: <defaults>
</compile_context>

<pallas_src>
import jax
import jax.numpy as jnp
from jax.experimental import pallas as pl
from jax.experimental.pallas import tpu as pltpu


_LANE = 128   # lane tile (last dim)
_SUB = 16     # sublane tile for bf16 (second-to-last dim)


def _round_up(x, m):
    return (x + m - 1) // m * m


# ----------------------------------------------------------------------------
# Kernel body
# ----------------------------------------------------------------------------
def _make_block_kernel(K, d, pad, padA, Lp, TN, c_in_p, c_out_p, has_downsample):
    M = TN * Lp                 # flattened (batch-tile * time) matmul M dimension
    off_h = padA - pad          # scratch row where conv2's causal window starts

    def compute(x_ref, w1_ref, b1_ref, w2_ref, b2_ref, out_ref, h_scr,
                wd_ref=None, bd_ref=None):
        # ---- conv1: K per-tap matmuls accumulated in f32 (no im2col copy).
        acc1 = jnp.zeros((M, c_out_p), jnp.float32)
        for j in range(K):
            xj = x_ref[:, j * d: j * d + Lp, :].reshape(M, c_in_p)
            acc1 += jnp.dot(xj, w1_ref[j * c_in_p:(j + 1) * c_in_p, :],
                            preferred_element_type=jnp.float32)
        h1 = jnp.maximum(acc1 + b1_ref[...], 0.0)               # (M, Cout) f32

        # Stage conv1 activation (bf16) with a sublane-aligned store. The causal
        # pad rows [0, padA) are left uninitialized; reads that land there are
        # masked out below, so no zero-fill traffic is needed (megacore-safe).
        h_scr[:, padA:, :] = h1.astype(jnp.bfloat16).reshape(TN, Lp, c_out_p)

        # ---- conv2: same per-tap accumulation, reading the staged activation.
        acc2 = jnp.zeros((M, c_out_p), jnp.float32)
        for j in range(K):
            s_j = pad - j * d        # leading rows falling in the (garbage) pad
            hj = h_scr[:, off_h + j * d: off_h + j * d + Lp, :]
            if s_j > 0:
                t_idx = jax.lax.broadcasted_iota(jnp.int32, (TN, Lp, 1), 1)
                hj = jnp.where(t_idx >= s_j, hj, jnp.zeros_like(hj))
            acc2 += jnp.dot(hj.reshape(M, c_out_p),
                            w2_ref[j * c_out_p:(j + 1) * c_out_p, :],
                            preferred_element_type=jnp.float32)
        h2 = jnp.maximum(acc2 + b2_ref[...], 0.0)               # (M, Cout) f32

        # ---- residual (1x1 conv if n_in != n_out, else identity) + final ReLU.
        x_res = x_ref[:, pad:, :].reshape(M, c_in_p)
        if has_downsample:
            res = (jnp.dot(x_res, wd_ref[...], preferred_element_type=jnp.float32)
                   + bd_ref[...])
        else:
            res = x_res.astype(jnp.float32)

        # bf16 writeback halves the output HBM stream / VMEM double-buffer.
        out_ref[...] = jnp.maximum(h2 + res, 0.0).astype(jnp.bfloat16).reshape(
            TN, Lp, c_out_p)

    if has_downsample:
        def kernel(x_ref, w1_ref, b1_ref, w2_ref, b2_ref, wd_ref, bd_ref,
                   out_ref, h_scr):
            compute(x_ref, w1_ref, b1_ref, w2_ref, b2_ref, out_ref, h_scr,
                    wd_ref=wd_ref, bd_ref=bd_ref)
    else:
        def kernel(x_ref, w1_ref, b1_ref, w2_ref, b2_ref, out_ref, h_scr):
            compute(x_ref, w1_ref, b1_ref, w2_ref, b2_ref, out_ref, h_scr)
    return kernel


# ----------------------------------------------------------------------------
# VMEM accounting / batch-tile selection
# ----------------------------------------------------------------------------
def _per_step_bytes(tn, t_in, t_scr, Lp, c_in_p, c_out_p, weight_bytes):
    """Per-grid-step VMEM live set, including f32 intermediates."""
    M = tn * Lp
    return (2 * tn * t_in * c_in_p * 2            # x block (bf16, double-buffered)
            + 2 * tn * Lp * c_out_p * 2           # out block (bf16, double-buffered)
            + tn * t_scr * c_out_p * 2            # bf16 conv1-activation scratch
            + 4 * M * c_out_p * 4                 # f32 acc1/h1/acc2/res live set
            + 2 * M * max(c_in_p, c_out_p) * 2    # bf16 tap-slice temporaries
            + 2 * weight_bytes)                   # weights (double-buffered)


def _pick_batch_tile(N, t_in, t_scr, Lp, c_in_p, c_out_p, weight_bytes, budget):
    """Largest divisor of N that fits the budget while keeping >=4 (>=2) grid steps."""
    divisors = [t for t in range(1, N + 1) if N % t == 0]
    fitting = [t for t in divisors
               if _per_step_bytes(t, t_in, t_scr, Lp, c_in_p, c_out_p,
                                  weight_bytes) <= budget] or [1]
    for min_steps in (4, 2, 1):          # prefer multi-step grids (megacore + pipeline)
        cands = [t for t in fitting if N // t >= min_steps]
        if cands:
            return max(cands)
    return 1


# ----------------------------------------------------------------------------
# Wrapper (PyTorch NCL layout at the edges)
# ----------------------------------------------------------------------------
def temporal_block(x_ncl, w1, b1, w2, b2, wd, bd, *, kernel_size, dilation):
    """TemporalBlock forward (eval mode).

    x_ncl : (N, C_in, L) f32
    w1    : (C_out, C_in, K)   b1: (C_out,)    conv1 effective weight/bias
    w2    : (C_out, C_out, K)  b2: (C_out,)    conv2
    wd    : (C_out, C_in, 1) or None, bd: (C_out,) or None   downsample 1x1
    returns (N, C_out, L) f32
    """
    N, C_in, L = x_ncl.shape
    C_out, _, K = w1.shape
    assert K == kernel_size and K >= 1
    d = dilation
    pad = (K - 1) * d                     # == PyTorch `padding` for a TCN block
    has_ds = wd is not None
    assert has_ds == (C_in != C_out)

    c_in_p = _round_up(C_in, _LANE)
    c_out_p = _round_up(C_out, _LANE)
    Lp = _round_up(L, _SUB)
    padA = _round_up(pad, _SUB)           # aligned pad used only for the scratch
    t_in = pad + Lp                       # exact causal pad on the HBM input
    t_scr = padA + Lp

    # NCL -> NLC, bf16, exact causal left pad + alignment pad in one fused transform.
    x = jnp.transpose(x_ncl, (0, 2, 1)).astype(jnp.bfloat16)
    x = jnp.pad(x, ((0, 0), (pad, Lp - L), (0, c_in_p - C_in)))

    def conv_weight(w):                   # (C_out, C_i, K) -> (K*C_i_p, C_out_p)
        co, ci, kk = w.shape
        ci_p = _round_up(ci, _LANE)
        wt = jnp.transpose(w, (2, 1, 0))  # (K, C_i, C_out): tap j -> rows j*C_i_p
        wt = jnp.pad(wt, ((0, 0), (0, ci_p - ci), (0, c_out_p - co)))
        return wt.reshape(kk * ci_p, c_out_p).astype(jnp.bfloat16)

    def bias(b):
        return jnp.pad(b.astype(jnp.float32),
                       (0, c_out_p - b.shape[0])).reshape(1, c_out_p)

    w1f, w2f = conv_weight(w1), conv_weight(w2)
    b1p, b2p = bias(b1), bias(b2)

    weight_bytes = (w1f.size + w2f.size) * 2 + (b1p.size + b2p.size) * 4
    if has_ds:
        weight_bytes += c_in_p * c_out_p * 2 + c_out_p * 4

    # Generation-aware VMEM budget (v7x: 64 MiB physical; v5e/v6e: 128 MiB).
    try:
        info = pltpu.get_tpu_info()
        vmem_cap = int(getattr(info, "vmem_capacity_bytes", 128 << 20))
    except Exception:  # pragma: no cover - conservative fallback
        vmem_cap = 128 << 20
    budget = max(16 << 20, int(vmem_cap * 0.55))

    TN = _pick_batch_tile(N, t_in, t_scr, Lp, c_in_p, c_out_p,
                          weight_bytes, budget)
    est = _per_step_bytes(TN, t_in, t_scr, Lp, c_in_p, c_out_p,
                          weight_bytes) + (8 << 20)
    vmem_limit = int(min(max(32 << 20, est), vmem_cap - (4 << 20)))

    kernel = _make_block_kernel(K, d, pad, padA, Lp, TN, c_in_p, c_out_p, has_ds)

    in_specs = [
        pl.BlockSpec((TN, t_in, c_in_p), lambda n: (n, 0, 0)),
        pl.BlockSpec((K * c_in_p, c_out_p), lambda n: (0, 0)),
        pl.BlockSpec((1, c_out_p), lambda n: (0, 0)),
        pl.BlockSpec((K * c_out_p, c_out_p), lambda n: (0, 0)),
        pl.BlockSpec((1, c_out_p), lambda n: (0, 0)),
    ]
    args = [x, w1f, b1p, w2f, b2p]
    if has_ds:
        wdp = jnp.pad(wd[:, :, 0].T,
                      ((0, c_in_p - C_in), (0, c_out_p - C_out))).astype(jnp.bfloat16)
        in_specs += [pl.BlockSpec((c_in_p, c_out_p), lambda n: (0, 0)),
                     pl.BlockSpec((1, c_out_p), lambda n: (0, 0))]
        args += [wdp, bias(bd)]

    out = pl.pallas_call(
        kernel,
        out_shape=jax.ShapeDtypeStruct((N, Lp, c_out_p), jnp.bfloat16),
        grid_spec=pltpu.PrefetchScalarGridSpec(
            num_scalar_prefetch=0,
            grid=(N // TN,),
            in_specs=in_specs,
            out_specs=pl.BlockSpec((TN, Lp, c_out_p), lambda n: (n, 0, 0)),
            scratch_shapes=[pltpu.VMEM((TN, t_scr, c_out_p), jnp.bfloat16)],
        ),
        compiler_params=pltpu.CompilerParams(
            dimension_semantics=("parallel",),
            vmem_limit_bytes=vmem_limit),
    )(*args)

    # Strip channel/time padding, back to PyTorch NCL (f32 at the module edge).
    return jnp.transpose(out[:, :L, :C_out], (0, 2, 1)).astype(jnp.float32)


# ----------------------------------------------------------------------------
# Pure-JAX reference (mirrors PyTorch TemporalBlock.forward in eval mode)
# ----------------------------------------------------------------------------
def ref_temporal_block(x, w1, b1, w2, b2, wd, bd, *, kernel_size, dilation):
    L = x.shape[2]
    pad = (kernel_size - 1) * dilation
    dn = ("NCH", "OIH", "NCH")

    def causal_conv(inp, w, b):
        out = jax.lax.conv_general_dilated(
            inp, w, window_strides=(1,), padding=[(pad, pad)],
            rhs_dilation=(dilation,), dimension_numbers=dn)
        out = out[:, :, :L]                            # Chomp1d(pad)
        return out + b[None, :, None]

    h = jax.nn.relu(causal_conv(x, w1, b1))            # dropout = identity (eval)
    h = jax.nn.relu(causal_conv(h, w2, b2))
    if wd is None:
        res = x
    else:
        res = jax.lax.conv_general_dilated(
            x, wd, (1,), [(0, 0)], dimension_numbers=dn) + bd[None, :, None]
    return jax.nn.relu(h + res)


if __name__ == "__main__":
    key = jax.random.PRNGKey(0)
    N, L = 2, 16
    kernel_size = 2

    # Case 1: n_inputs != n_outputs (1x1 downsample residual), dilation 1.
    # Case 2: n_inputs == n_outputs (identity residual, specialized kernel), dilation 2.
    configs = [dict(c_in=4, c_out=8, dilation=1),
               dict(c_in=8, c_out=8, dilation=2)]

    for cfg in configs:
        C_in, C_out, d = cfg["c_in"], cfg["c_out"], cfg["dilation"]
        key, kx, k1, k2, k3, k4, k5, k6 = jax.random.split(key, 8)
        x = jax.random.normal(kx, (N, C_in, L), jnp.float32)
        w1 = 0.01 * jax.random.normal(k1, (C_out, C_in, kernel_size), jnp.float32)
        b1 = 0.01 * jax.random.normal(k2, (C_out,), jnp.float32)
        w2 = 0.01 * jax.random.normal(k3, (C_out, C_out, kernel_size), jnp.float32)
        b2 = 0.01 * jax.random.normal(k4, (C_out,), jnp.float32)
        if C_in != C_out:
            wd = 0.01 * jax.random.normal(k5, (C_out, C_in, 1), jnp.float32)
            bd = 0.01 * jax.random.normal(k6, (C_out,), jnp.float32)
        else:
            wd, bd = None, None

        out = temporal_block(x, w1, b1, w2, b2, wd, bd,
                             kernel_size=kernel_size, dilation=d)
        out = jax.block_until_ready(out)
        ref = ref_temporal_block(x, w1, b1, w2, b2, wd, bd,
                                 kernel_size=kernel_size, dilation=d)

        assert out.shape == (N, C_out, L)
        assert bool(jnp.all(jnp.isfinite(out)))
        # bf16 activations/weights + bf16 output writeback vs f32 reference.
        err = float(jnp.max(jnp.abs(out - ref)))
        assert err < 4e-2, f"mismatch vs reference (max abs err {err})"

    print("KERNEL_OK")
</pallas_src>

<mosaic_0001>
module attributes {stable_mosaic.version = 11 : i64} {
  func.func @kernel(%arg0: i32, %arg1: memref<1x17x128xbf16, #tpu.memory_space<vmem>>, %arg2: memref<256x128xbf16, #tpu.memory_space<vmem>>, %arg3: memref<1x128xf32, #tpu.memory_space<vmem>>, %arg4: memref<256x128xbf16, #tpu.memory_space<vmem>>, %arg5: memref<1x128xf32, #tpu.memory_space<vmem>>, %arg6: memref<128x128xbf16, #tpu.memory_space<vmem>>, %arg7: memref<1x128xf32, #tpu.memory_space<vmem>>, %arg8: memref<1x16x128xbf16, #tpu.memory_space<vmem>>, %arg9: memref<1x32x128xbf16, #tpu.memory_space<vmem>>) attributes {dimension_semantics = [#tpu.dimension_semantics<parallel>], iteration_bounds = array<i64: 2>, scalar_prefetch = 0 : i64, scratch_operands = 1 : i64, tpu.core_type = #tpu.core_type<tc>, window_params = [{transform_indices = @transform_0, window_bounds = array<i64: 1, 17, 128>}, {pipeline_mode = #tpu.pipeline_mode<synchronous>, transform_indices = @transform_1, window_bounds = array<i64: 256, 128>}, {pipeline_mode = #tpu.pipeline_mode<synchronous>, transform_indices = @transform_2, window_bounds = array<i64: 1, 128>}, {pipeline_mode = #tpu.pipeline_mode<synchronous>, transform_indices = @transform_3, window_bounds = array<i64: 256, 128>}, {pipeline_mode = #tpu.pipeline_mode<synchronous>, transform_indices = @transform_4, window_bounds = array<i64: 1, 128>}, {pipeline_mode = #tpu.pipeline_mode<synchronous>, transform_indices = @transform_5, window_bounds = array<i64: 128, 128>}, {pipeline_mode = #tpu.pipeline_mode<synchronous>, transform_indices = @transform_6, window_bounds = array<i64: 1, 128>}, {transform_indices = @transform_7, window_bounds = array<i64: 1, 16, 128>}]} {
    %cst = arith.constant 0.000000e+00 : f32
    %0 = vector.broadcast %cst : f32 to vector<16x128xf32>
    %c0 = arith.constant 0 : index
    %c0_0 = arith.constant 0 : index
    %c0_1 = arith.constant 0 : index
    %1 = vector.load %arg1[%c0, %c0_0, %c0_1] : memref<1x17x128xbf16, #tpu.memory_space<vmem>>, vector<1x16x128xbf16>
    %2 = vector.shape_cast %1 : vector<1x16x128xbf16> to vector<16x128xbf16>
    %c0_2 = arith.constant 0 : index
    %c0_3 = arith.constant 0 : index
    %3 = vector.load %arg2[%c0_2, %c0_3] : memref<256x128xbf16, #tpu.memory_space<vmem>>, vector<128x128xbf16>
    %cst_4 = arith.constant dense<0.000000e+00> : vector<16x128xf32>
    %4 = tpu.matmul %2, %3, %cst_4 {dimension_numbers = #tpu.dot_dimension_numbers<[1], [0], [0], [1], [0, 0, 1, 1], [], []>} : vector<16x128xbf16>, vector<128x128xbf16>, vector<16x128xf32> -> vector<16x128xf32>
    %5 = arith.addf %0, %4 : vector<16x128xf32>
    %c0_5 = arith.constant 0 : index
    %c1 = arith.constant 1 : index
    %c0_6 = arith.constant 0 : index
    %6 = vector.load %arg1[%c0_5, %c1, %c0_6] : memref<1x17x128xbf16, #tpu.memory_space<vmem>>, vector<1x16x128xbf16>
    %7 = vector.shape_cast %6 : vector<1x16x128xbf16> to vector<16x128xbf16>
    %c128 = arith.constant 128 : index
    %c0_7 = arith.constant 0 : index
    %8 = vector.load %arg2[%c128, %c0_7] : memref<256x128xbf16, #tpu.memory_space<vmem>>, vector<128x128xbf16>
    %cst_8 = arith.constant dense<0.000000e+00> : vector<16x128xf32>
    %9 = tpu.matmul %7, %8, %cst_8 {dimension_numbers = #tpu.dot_dimension_numbers<[1], [0], [0], [1], [0, 0, 1, 1], [], []>} : vector<16x128xbf16>, vector<128x128xbf16>, vector<16x128xf32> -> vector<16x128xf32>
    %10 = arith.addf %5, %9 : vector<16x128xf32>
    %c0_9 = arith.constant 0 : index
    %c0_10 = arith.constant 0 : index
    %11 = vector.load %arg3[%c0_9, %c0_10] : memref<1x128xf32, #tpu.memory_space<vmem>>, vector<1x128xf32>
    %12 = vector.broadcast %11 : vector<1x128xf32> to vector<16x128xf32>
    %13 = arith.addf %10, %12 : vector<16x128xf32>
    %cst_11 = arith.constant 0.000000e+00 : f32
    %14 = vector.broadcast %cst_11 : f32 to vector<16x128xf32>
    %15 = arith.maximumf %13, %14 : vector<16x128xf32>
    %16 = arith.truncf %15 : vector<16x128xf32> to vector<16x128xbf16>
    %17 = vector.shape_cast %16 : vector<16x128xbf16> to vector<1x16x128xbf16>
    %c0_12 = arith.constant 0 : index
    %c16 = arith.constant 16 : index
    %c0_13 = arith.constant 0 : index
    %18 = vector.load %arg9[%c0_12, %c16, %c0_13] : memref<1x32x128xbf16, #tpu.memory_space<vmem>>, vector<1x16x128xbf16>
    tpu.vector_store %arg9[%c0_12, %c16, %c0_13], %17 {strides = array<i32>} : memref<1x32x128xbf16, #tpu.memory_space<vmem>>, vector<1x16x128xbf16>,
    %cst_14 = arith.constant 0.000000e+00 : f32
    %19 = vector.broadcast %cst_14 : f32 to vector<16x128xf32>
    %c0_15 = arith.constant 0 : index
    %c15 = arith.constant 15 : index
    %c0_16 = arith.constant 0 : index
    %20 = vector.load %arg9[%c0_15, %c15, %c0_16] : memref<1x32x128xbf16, #tpu.memory_space<vmem>>, vector<1x16x128xbf16>
    %21 = tpu.iota {dimensions = array<i32: 1>} : vector<1x16x1xi32>
    %c1_i32 = arith.constant 1 : i32
    %22 = vector.broadcast %c1_i32 : i32 to vector<1x16x1xi32>
    %23 = arith.cmpi sge, %21, %22 : vector<1x16x1xi32>
    %cst_17 = arith.constant 0.000000e+00 : bf16
    %24 = vector.broadcast %cst_17 : bf16 to vector<1x16x128xbf16>
    %25 = vector.shape_cast %23 : vector<1x16x1xi1> to vector<1x16x1xi1>
    %26 = vector.broadcast %25 : vector<1x16x1xi1> to vector<1x16x128xi1>
    %27 = arith.select %26, %20, %24 : vector<1x16x128xi1>, vector<1x16x128xbf16>
    %28 = vector.shape_cast %27 : vector<1x16x128xbf16> to vector<16x128xbf16>
    %c0_18 = arith.constant 0 : index
    %c0_19 = arith.constant 0 : index
    %29 = vector.load %arg4[%c0_18, %c0_19] : memref<256x128xbf16, #tpu.memory_space<vmem>>, vector<128x128xbf16>
    %cst_20 = arith.constant dense<0.000000e+00> : vector<16x128xf32>
    %30 = tpu.matmul %28, %29, %cst_20 {dimension_numbers = #tpu.dot_dimension_numbers<[1], [0], [0], [1], [0, 0, 1, 1], [], []>} : vector<16x128xbf16>, vector<128x128xbf16>, vector<16x128xf32> -> vector<16x128xf32>
    %31 = arith.addf %19, %30 : vector<16x128xf32>
    %c0_21 = arith.constant 0 : index
    %c16_22 = arith.constant 16 : index
    %c0_23 = arith.constant 0 : index
    %32 = vector.load %arg9[%c0_21, %c16_22, %c0_23] : memref<1x32x128xbf16, #tpu.memory_space<vmem>>, vector<1x16x128xbf16>
    %33 = vector.shape_cast %32 : vector<1x16x128xbf16> to vector<16x128xbf16>
    %c128_24 = arith.constant 128 : index
    %c0_25 = arith.constant 0 : index
    %34 = vector.load %arg4[%c128_24, %c0_25] : memref<256x128xbf16, #tpu.memory_space<vmem>>, vector<128x128xbf16>
    %cst_26 = arith.constant dense<0.000000e+00> : vector<16x128xf32>
    %35 = tpu.matmul %33, %34, %cst_26 {dimension_numbers = #tpu.dot_dimension_numbers<[1], [0], [0], [1], [0, 0, 1, 1], [], []>} : vector<16x128xbf16>, vector<128x128xbf16>, vector<16x128xf32> -> vector<16x128xf32>
    %36 = arith.addf %31, %35 : vector<16x128xf32>
    %c0_27 = arith.constant 0 : index
    %c0_28 = arith.constant 0 : index
    %37 = vector.load %arg5[%c0_27, %c0_28] : memref<1x128xf32, #tpu.memory_space<vmem>>, vector<1x128xf32>
    %38 = vector.broadcast %37 : vector<1x128xf32> to vector<16x128xf32>
    %39 = arith.addf %36, %38 : vector<16x128xf32>
    %cst_29 = arith.constant 0.000000e+00 : f32
    %40 = vector.broadcast %cst_29 : f32 to vector<16x128xf32>
    %41 = arith.maximumf %39, %40 : vector<16x128xf32>
    %c0_30 = arith.constant 0 : index
    %c1_31 = arith.constant 1 : index
    %c0_32 = arith.constant 0 : index
    %42 = vector.load %arg1[%c0_30, %c1_31, %c0_32] : memref<1x17x128xbf16, #tpu.memory_space<vmem>>, vector<1x16x128xbf16>
    %43 = vector.shape_cast %42 : vector<1x16x128xbf16> to vector<16x128xbf16>
    %c0_33 = arith.constant 0 : index
    %c0_34 = arith.constant 0 : index
    %44 = vector.load %arg6[%c0_33, %c0_34] : memref<128x128xbf16, #tpu.memory_space<vmem>>, vector<128x128xbf16>
    %cst_35 = arith.constant dense<0.000000e+00> : vector<16x128xf32>
    %45 = tpu.matmul %43, %44, %cst_35 {dimension_numbers = #tpu.dot_dimension_numbers<[1], [0], [0], [1], [0, 0, 1, 1], [], []>} : vector<16x128xbf16>, vector<128x128xbf16>, vector<16x128xf32> -> vector<16x128xf32>
    %c0_36 = arith.constant 0 : index
    %c0_37 = arith.constant 0 : index
    %46 = vector.load %arg7[%c0_36, %c0_37] : memref<1x128xf32, #tpu.memory_space<vmem>>, vector<1x128xf32>
    %47 = vector.broadcast %46 : vector<1x128xf32> to vector<16x128xf32>
    %48 = arith.addf %45, %47 : vector<16x128xf32>
    %49 = arith.addf %41, %48 : vector<16x128xf32>
    %cst_38 = arith.constant 0.000000e+00 : f32
    %50 = vector.broadcast %cst_38 : f32 to vector<16x128xf32>
    %51 = arith.maximumf %49, %50 : vector<16x128xf32>
    %52 = arith.truncf %51 : vector<16x128xf32> to vector<16x128xbf16>
    %53 = vector.shape_cast %52 : vector<16x128xbf16> to vector<1x16x128xbf16>
    %c0_39 = arith.constant 0 : index
    %c0_40 = arith.constant 0 : index
    %c0_41 = arith.constant 0 : index
    %54 = vector.load %arg8[%c0_39, %c0_40, %c0_41] : memref<1x16x128xbf16, #tpu.memory_space<vmem>>, vector<1x16x128xbf16>
    tpu.vector_store %arg8[%c0_39, %c0_40, %c0_41], %53 {strides = array<i32>} : memref<1x16x128xbf16, #tpu.memory_space<vmem>>, vector<1x16x128xbf16>,
    return
  }
  func.func @transform_0(%arg0: i32) -> (i32, i32, i32) {
    %c0_i32 = arith.constant 0 : i32
    %c0_i32_0 = arith.constant 0 : i32
    %c0_i32_1 = arith.constant 0 : i32
    return %arg0, %c0_i32, %c0_i32_0 : i32, i32, i32
  }
  func.func @transform_1(%arg0: i32) -> (i32, i32) {
    %c0_i32 = arith.constant 0 : i32
    %c0_i32_0 = arith.constant 0 : i32
    %c0_i32_1 = arith.constant 0 : i32
    return %c0_i32, %c0_i32_0 : i32, i32
  }
  func.func @transform_2(%arg0: i32) -> (i32, i32) {
    %c0_i32 = arith.constant 0 : i32
    %c0_i32_0 = arith.constant 0 : i32
    %c0_i32_1 = arith.constant 0 : i32
    return %c0_i32, %c0_i32_0 : i32, i32
  }
  func.func @transform_3(%arg0: i32) -> (i32, i32) {
    %c0_i32 = arith.constant 0 : i32
    %c0_i32_0 = arith.constant 0 : i32
    %c0_i32_1 = arith.constant 0 : i32
    return %c0_i32, %c0_i32_0 : i32, i32
  }
  func.func @transform_4(%arg0: i32) -> (i32, i32) {
    %c0_i32 = arith.constant 0 : i32
    %c0_i32_0 = arith.constant 0 : i32
    %c0_i32_1 = arith.constant 0 : i32
    return %c0_i32, %c0_i32_0 : i32, i32
  }
  func.func @transform_5(%arg0: i32) -> (i32, i32) {
    %c0_i32 = arith.constant 0 : i32
    %c0_i32_0 = arith.constant 0 : i32
    %c0_i32_1 = arith.constant 0 : i32
    return %c0_i32, %c0_i32_0 : i32, i32
  }
  func.func @transform_6(%arg0: i32) -> (i32, i32) {
    %c0_i32 = arith.constant 0 : i32
    %c0_i32_0 = arith.constant 0 : i32
    %c0_i32_1 = arith.constant 0 : i32
    return %c0_i32, %c0_i32_0 : i32, i32
  }
  func.func @transform_7(%arg0: i32) -> (i32, i32, i32) {
    %c0_i32 = arith.constant 0 : i32
    %c0_i32_0 = arith.constant 0 : i32
    %c0_i32_1 = arith.constant 0 : i32
    return %arg0, %c0_i32, %c0_i32_0 : i32, i32, i32
  }
}

</mosaic_0001>

<bundles_post_ra>
// kernel: tpu_custom_call.1
= control target key start
LH: loop header
LB: loop body
LE: loop exit
PB: predicated region body
PF: predicated region fallthrough
CT: control target
= control target key end

     0   :  { %s1681_s0 = inlined_call_operand.vmem [shape: bf16[2,17,128], index: 0, kind: input, shape index: {}]   ;;  %s1682_s1 = inlined_call_operand.hbm [shape: bf16[256,128], index: 1, kind: input, shape index: {}]   ;;  %s1683_s2 = inlined_call_operand.vmem [shape: f32[1,128], index: 2, kind: input, shape index: {}]   ;;  %s1684_s3 = inlined_call_operand.hbm [shape: bf16[256,128], index: 3, kind: input, shape index: {}]   ;;  %s1685_s4 = inlined_call_operand.vmem [shape: f32[1,128], index: 4, kind: input, shape index: {}]   ;;  %s1686_s5 = inlined_call_operand.hbm [shape: bf16[128,128], index: 5, kind: input, shape index: {}]   ;;  %s1687_s6 = inlined_call_operand.vmem [shape: f32[1,128], index: 6, kind: input, shape index: {}]   ;;  %s1688_s7 = inlined_call_operand.hbm [shape: bf16[2,16,128], index: 7, kind: output, shape index: {}]  }
   0x1   :  { %1689 = sst [smem:[#allocation13_spill]] %s1682_s1 }
   0x2   :  { %12 = vsyncpa [#allocation4], 0 }
   0x3   :  { %13 = vsyncpa [#allocation7], 0 }
   0x4   :  { %14 = vsyncpa [#allocation5], 0 }
   0x5   :  { %16 = vsyncpa [#allocation5 + $0x1], 0  ;;  %s1541_s24 = smov 0   ;;  %s1543_s25 = smov 0  }
   0x6   :  { %s1545_s26 = smov 0   ;;  %s1547_s27 = smov 0  }
   0x7 LB: > { %s1562_s28 = sadd.s32 4294967295, %s1490_s27   ;;  %s1006_s29 = sadd.s32 4294967294, %s1490_s27   ;;  %s1490_s27 = sphi %s1547_s27, %s1698_s27   ;;  %s1486_s26 = sphi %s1545_s26, %s1697_s26   ;;  %s1482_s25 = sphi %s1543_s25, %s1696_s25   ;;  %s1478_s24 = sphi %s1541_s24, %s1695_s24  }
   0x8   : > { %s1566_s30 = sadd.s32 1, %s1490_s27   ;;  %s181_s8 = sadd.s32 1, %s1486_s26 }
   0x9   : > { %s178_s9 = ssub.s32 %s1490_s27, %s1566_s30  ;;  %p191_p0 = scmp.ne.s32.totalorder %s1486_s26, %s1482_s25 }
   0xa   : > { %p179_p1 = scmp.eq.s32.totalorder %s178_s9, 0  ;;  %p192_p2 = scmp.eq.s32.totalorder %s1562_s28, 1 }
   0xb   : > { %p197_p3 = scmp.ne.s32.totalorder %s1482_s25, %s1478_s24  ;;  %p198_p4 = scmp.eq.s32.totalorder %s1006_s29, 1 }
   0xc   : > { %s1577_s10 = scalar_select %p179_p1, %s1486_s26, %s181_s8  }
   0xd   : > { %p1579_p5 = por %p192_p2, %p191_p0  ;;  %p1583_p6 = por %p198_p4, %p197_p3 }
   0xe   : > { %p1007_p7 = scmp.ge.s32.totalorder %s1490_s27, 1  ;;  %p205_p8 = scmp.lt.s32.totalorder %s1490_s27, 3 }
   0xf   : > { %p1279_p9 = scmp.eq.s32.totalorder %s1562_s28, 0  ;;  %s233_s16 = sshll.u32 %s1684_s3, 4  ;;  %s234_s16 = int_to_ptr.hbm [resolvable:$true] %s233_s16 }
  0x10   : > { %p1590_p10 = pnand %p1007_p7, %p205_p8  ;;  %s1693_s1 = sld [smem:[#allocation13_spill]] }
  0x11   : > { %s1492_s21 = smov [#allocation6]   ;;  %s1493_s23 = smov 64  }
  0x12   : > { %p1265_p11 = pneg %p1590_p10  ;;  %s235_s22 = sshll.u32 %s1492_s21, 4  ;;  %s236_s22 = int_to_ptr.vmem [resolvable:$true] %s235_s22 }
  0x13   : > { %s1494_s29 = smov 4   ;;  %s1495_s8 = smov [#allocation3]  }
  0x14   : > { %p1604_p12 = pnand %p1279_p9, %p1265_p11  ;;  %s218_s9 = sshll.u32 %s1495_s8, 4  ;;  %s219_s9 = int_to_ptr.vmem [resolvable:$true] %s218_s9 }
  0x15   : > { %s250_s17 = sshll.u32 %s1686_s5, 4  ;;  %s1496_s18 = smov [#allocation8]   ;;  %s251_s17 = int_to_ptr.hbm [resolvable:$true] %s250_s17 }
  0x16   : > { %s216_s19 = sshll.u32 %s1693_s1, 4  ;;  %s252_s1 = sshll.u32 %s1496_s18, 4  ;;  %s217_s19 = int_to_ptr.hbm [resolvable:$true] %s216_s19  ;;  %s253_s1 = int_to_ptr.vmem [resolvable:$true] %s252_s1 }
  0x17   : > { %1271 = dma.hbm_to_vmem [thread:$0]  (!%p1604_p12), %s234_s16, 2048, %s236_s22, [#allocation7], %s1493_s23, %s1493_s23, %s1494_s29  }
  0x18   : > { %1268 = dma.hbm_to_vmem [thread:$0]  (!%p1604_p12), %s217_s19, 2048, %s219_s9, [#allocation4], %s1493_s23, %s1493_s23, %s1494_s29  }
  0x19   : > { %1274 = dma.hbm_to_vmem [thread:$0]  (!%p1604_p12), %s251_s17, 1024, %s253_s1, [#allocation7], %s1493_s23, %s1493_s23, %s1494_s29  }
  0x1a   : > { %279 = sbr.rel (%p1590_p10) target bundleno = 386 (0x182), region = 48 }
  0x1f   : > { %1465 = dma.done.wait (%p1279_p9), [#allocation4], 2048  }
  0x20   : > { %1467 = vsyncadd (%p1279_p9), [#allocation4], 4294965248 }
  0x21   : > { %1469 = dma.done.wait (%p1279_p9), [#allocation7], 3072  }
  0x22   : > { %1471 = vsyncadd (%p1279_p9), [#allocation7], 4294964224  ;;  %p322_p13 = scmp.lt.s32.totalorder %s1562_s28, 1  ;;  %v1211_v0 = vld [vmem:[#allocation3 + $0x78] sm:$0xff]  ;;  %v1210_v2 = vld [vmem:[#allocation3 + $0x70] sm:$0xff]  ;;  %v527_v35 = vlaneseq  ;;  %vm1497_vm3 = vmmov 1  }
  0x23   : > { %v1203_v1 = vld [vmem:[#allocation3 + $0x38] sm:$0xff]  ;;  %435 = vmatpush.bf16.msra.mxu0 %v1211_v0  ;;  %v1202_v3 = vld [vmem:[#allocation3 + $0x30] sm:$0xff]  ;;  %v1209_v4 = vld [vmem:[#allocation3 + $0x68] sm:$0xff]  ;;  %vm373_vm0 = vsmask.f32 7424  ;;  %v1498_v48 = vmov 0  }
  0x24   : > { %s323_s1 = scalar_select %p322_p13, %s1562_s28, 1  ;;  %498 = vmatpush.bf16.msra.mxu1 %v1203_v1  ;;  %v1201_v5 = vld [vmem:[#allocation3 + $0x28] sm:$0xff]  ;;  %v1228_v6 = vld [vmem:[#allocation6 + $0x78] sm:$0xff]  ;;  %v1208_v7 = vld [vmem:[#allocation3 + $0x60] sm:$0xff]  ;;  %v528_v39 = vshrl.u32 %v527_v35, 7 }
  0x25   : > { %672 = vmatpush.bf16.msra.mxu2 %v1228_v6  ;;  %v1200_v8 = vld [vmem:[#allocation3 + $0x20] sm:$0xff]  ;;  %v1207_v10 = vld [vmem:[#allocation3 + $0x58] sm:$0xff]  ;;  %v1206_v14 = vld [vmem:[#allocation3 + $0x50] sm:$0xff]  ;;  %vm540_vm5 = vsmask.f32 3328  ;;  %s319_s14 = sand.u32 1, %s1482_s25  }
  0x26   : > { %s1250_s13 = smul.u32 12, %s323_s1  ;;  %v1199_v11 = vld [vmem:[#allocation3 + $0x18] sm:$0xff]  ;;  %v1198_v15 = vld [vmem:[#allocation3 + $0x10] sm:$0xff]  ;;  %v1205_v18 = vld [vmem:[#allocation3 + $0x48] sm:$0xff]  ;;  %vm530_vm1 = vcmp.ge.s32.totalorder %v528_v39, 1  ;;  %s1016_s15 = sshll.u32 %s319_s14, 3 }
  0x27   : > { %436 = vmatpush.bf16.msra.mxu0 %v1210_v2  ;;  %v1197_v19 = vld [vmem:[#allocation3 + $0x8] sm:$0xff]  ;;  %v1204_v23 = vld [vmem:[#allocation3 + $0x40] sm:$0xff]  ;;  %v1227_v28 = vld [vmem:[#allocation6 + $0x70] sm:$0xff]  ;;  %vm541_vm6 = vsmask.f32 7440  ;;  %s1238_s17 = sshll.u32 %s1562_s28, 3 }
  0x28   : > { %499 = vmatpush.bf16.msra.mxu1 %v1202_v3  ;;  %s1632_s20 = scalar_lea.vmem %s1681_s0, %s1250_s13  ;;  %v1196_v24 = vld [vmem:[#allocation3] sm:$0xff]  ;;  %v1226_v29 = vld [vmem:[#allocation6 + $0x68] sm:$0xff]  ;;  %v1220_v30 = vld [vmem:[#allocation6 + $0x38] sm:$0xff]  ;;  %s909_s13 = scalar_lea.hbm %s1688_s7, %s1238_s17 }
  0x29   : > { %v348_v9 = vld [vmem:[%s1632_s20 + $0x8] sm:$0x1]  ;;  %v1195_v12 = vld [vmem:[%s1632_s20] sm:$0xff]  ;;  %673 = vmatpush.bf16.msra.mxu2 %v1227_v28  ;;  %v1225_v31 = vld [vmem:[#allocation6 + $0x60] sm:$0xff]  ;;  %761 = vmatpush.bf16.msra.mxu3 %v1220_v30  ;;  %v565_v28 = vunpack.c.h.b16 %v1498_v48  ;;  %s321_s16 = scalar_lea.vmem [#allocation9], %s1016_s15  ;;  %s898_s28 = scalar_lea.sflag [#allocation5], %s319_s14 }
  0x2a   : > { %v370_v13 = vunpack.c.l.b16 %v348_v9  ;;  %v377_v17 = vshll.u32 %v1195_v12, 16  ;;  %v375_v20 = vshrl.u32 %v1195_v12, 16  ;;  %v1237_v32 = vld [vmem:[#allocation8 + $0x38] sm:$0xff]  ;;  %v1219_v33 = vld [vmem:[#allocation6 + $0x30] sm:$0xff]  ;;  %v1218_v37 = vld [vmem:[#allocation6 + $0x28] sm:$0xff]  ;;  %s910_s19 = sshll.u32 %s321_s16, 4  ;;  %s911_s19 = int_to_ptr.vmem [resolvable:$true] %s910_s19 }
  0x2b   : > { %437 = vmatpush.bf16.msra.mxu0 %v1209_v4  ;;  %v1224_v34 = vld [vmem:[#allocation6 + $0x58] sm:$0xff]  ;;  %v1236_v36 = vld [vmem:[#allocation8 + $0x30] sm:$0xff]  ;;  %v1235_v40 = vld [vmem:[#allocation8 + $0x28] sm:$0xff]  ;;  %s1440_s8 = scalar_lea.hbm %s1688_s7, 16 }
  0x2c   : > { %500 = vmatpush.bf16.msra.mxu1 %v1201_v5  ;;  %v372_v16 = vpack.c.b16 %v370_v13, %v370_v13  ;;  %v379_v21 = vrot.slane %v377_v17, 1  ;;  %v1223_v38 = vld [vmem:[#allocation6 + $0x50] sm:$0xff]  ;;  %v1217_v41 = vld [vmem:[#allocation6 + $0x20] sm:$0xff]  ;;  %v1222_v42 = vld [vmem:[#allocation6 + $0x48] sm:$0xff] }
  0x2d   : > { %674 = vmatpush.bf16.msra.mxu2 %v1226_v29  ;;  %762 = vmatpush.bf16.msra.mxu3 %v1219_v33  ;;  %v1234_v43 = vld [vmem:[#allocation8 + $0x20] sm:$0xff]  ;;  %v1216_v44 = vld [vmem:[#allocation6 + $0x18] sm:$0xff]  ;;  %vm536_vm2 = vmpackc.low %vm530_vm1, %vm530_vm1  ;;  %vm694_vm1 = vsmask.f32 4352 }
  0x2e   : > { %v382_v22 = vshll.u32 %v372_v16, 16  ;;  %v380_v25 = vor.u32 %v379_v21, %v375_v20  ;;  %v1221_v45 = vld [vmem:[#allocation6 + $0x40] sm:$0xff]  ;;  %v1233_v46 = vld [vmem:[#allocation8 + $0x18] sm:$0xff]  ;;  %v1215_v47 = vld [vmem:[#allocation6 + $0x10] sm:$0xff]  ;;  %v538_v49 = vsel %vm536_vm2, 65537, %v1498_v48 }
  0x2f   : > { %438 = vmatpush.bf16.msra.mxu0 %v1208_v7  ;;  %vm537_vm4 = vmpackc.low %vm1497_vm3, %vm1497_vm3  ;;  %v1232_v50 = vld [vmem:[#allocation8 + $0x10] sm:$0xff]  ;;  %v1214_v51 = vld [vmem:[#allocation6 + $0x8] sm:$0xff]  ;;  %v544_v53 = vshll.u32 %v538_v49, 16  ;;  %v547_v54 = vshrl.u32 %v538_v49, 16 }
  0x30   : > { %501 = vmatpush.bf16.msra.mxu1 %v1200_v8  ;;  %v384_v26 = vrot.slane %v382_v22, 1  ;;  %v539_v52 = vsel %vm537_vm4, 65537, %v1498_v48  ;;  %v1231_v55 = vld [vmem:[#allocation8 + $0x8] sm:$0xff]  ;;  %v785_v58 = vld [vmem:[%s1632_s20 + $0x8] sm:$0x1]  ;;  %v1213_v59 = vld [vmem:[#allocation6] sm:$0xff] }
  0x31   : > { %675 = vmatpush.bf16.msra.mxu2 %v1225_v31  ;;  %763 = vmatpush.bf16.msra.mxu3 %v1218_v37  ;;  %v553_v56 = vshll.u32 %v539_v52, 16  ;;  %v557_v57 = vshrl.u32 %v539_v52, 16  ;;  %v546_v60 = vrot.slane %v544_v53, 5  ;;  %v549_v61 = vrot.slane %v547_v54, 4  ;;  %v1229_v62 = vld [vmem:[%s1632_s20] sm:$0xff]  ;;  %v1230_v2 = vld [vmem:[#allocation8] sm:$0xff]  ;;  %vm542_vm7 = vmor %vm540_vm5, %vm541_vm6 }
  0x32   : > { %v385_v27 = vsel %vm373_vm0, %v380_v25, %v384_v26  ;;  %v811_v63 = vunpack.c.l.b16 %v785_v58  ;;  %v817_v4 = vshll.u32 %v1229_v62, 16  ;;  %v815_v8 = vshrl.u32 %v1229_v62, 16  ;;  %s912_s20 = sshll.u32 %s909_s13, 4  ;;  %s913_s20 = int_to_ptr.hbm [resolvable:$true] %s912_s20 }
  0x33   : > { %439 = vmatpush.bf16.msra.mxu0 %v1207_v10  ;;  %v555_v5 = vrot.slane %v553_v56, 5  ;;  %v559_v6 = vrot.slane %v557_v57, 4  ;;  %v550_v7 = vor.u32 %v549_v61, %v546_v60  ;;  %v563_v26 = vunpack.c.h.b16 %v546_v60  ;;  %s1434_s21 = sshra.s32 %s913_s20, 4  ;;  %s1435_s21 = int_to_ptr.hbm [resolvable:$true] %s1434_s21 }
  0x34   : > { %502 = vmatpush.bf16.msra.mxu1 %v1199_v11  ;;  %v813_v3 = vpack.c.b16 %v811_v63, %v811_v63  ;;  %v819_v9 = vrot.slane %v817_v4, 1  ;;  %v1329_v63 = vld [vmem:[%s1685_s4] ss:$0 sm:$0xff]  ;;  %s1436_s22 = scalar_lea.hbm %s1435_s21, 8  ;;  %p1441_p3 = scmp.lt.s32.totalorder %s1435_s21, %s1688_s7 }
  0x35   : > { %676 = vmatpush.bf16.msra.mxu2 %v1224_v34  ;;  %764 = vmatpush.bf16.msra.mxu3 %v1217_v41  ;;  %v560_v16 = vor.u32 %v559_v6, %v555_v5  ;;  %vm567_vm9 = vcmp.ne.s32.totalorder %v563_v26, %v565_v28  ;;  %p1437_p0 = scmp.ne.s32.totalorder %s1435_s21, %s1436_s22  ;;  %p1442_p4 = scmp.lt.s32.totalorder %s1440_s8, %s1436_s22 }
  0x36   : > { %v822_v10 = vshll.u32 %v813_v3, 16  ;;  %v820_v11 = vor.u32 %v819_v9, %v815_v8 }
  0x37   : > { %440 = vmatpush.bf16.msra.mxu0 %v1206_v14  ;;  %v1327_v14 = vld [vmem:[%s1683_s2] ss:$0 sm:$0xff]  ;;  %p1438_p1 = pnand %p1437_p0, %p1579_p5  ;;  %p1443_p7 = por %p1442_p4, %p1441_p3 }
  0x38   : > { %503 = vmatpush.bf16.msra.mxu1 %v1198_v15  ;;  %v551_v15 = vrot.slane %v550_v7, 4 }
  0x39   : > { %677 = vmatpush.bf16.msra.mxu2 %v1223_v38  ;;  %765 = vmatpush.bf16.msra.mxu3 %v1216_v44  ;;  %p1439_p2 = pneg %p1438_p1 }
  0x3a   : > { %v556_v22 = vsel %vm542_vm7, %v551_v15, %v555_v5 }
  0x3b   : > { %441 = vmatpush.bf16.msra.mxu0 %v1205_v18  ;;  %v569_v31 = vunpack.c.l.b16 %v556_v22  ;;  %p1444_p8 = pnand %p1443_p7, %p1439_p2 }
  0x3c   : > { %504 = vmatpush.bf16.msra.mxu1 %v1197_v19 }
  0x3d   : > { %678 = vmatpush.bf16.msra.mxu2 %v1222_v42  ;;  %766 = vmatpush.bf16.msra.mxu3 %v1215_v47 }
  0x3f   : > { %442 = vmatpush.bf16.msra.mxu0 %v1204_v23  ;;  %v561_v23 = vrot.slane %v560_v16, 4 }
  0x40   : > { %505 = vmatpush.bf16.msra.mxu1 %v1196_v24  ;;  %v562_v24 = vunpack.c.l.b16 %v546_v60 }
  0x41   : > { %679 = vmatpush.bf16.msra.mxu2 %v1221_v45  ;;  %767 = vmatpush.bf16.msra.mxu3 %v1214_v51  ;;  %v576_v33 = vunpack.c.l.b16 %v561_v23  ;;  %v577_v35 = vunpack.c.h.b16 %v561_v23 }
  0x42   : > { %443 = vmatmul.bf16.vlgmr.msra.gmra.mxu0 %v385_v27  ;;  %v564_v27 = vunpack.c.l.b16 %v1498_v48 }
  0x43   : > { %506 = vmatmul.bf16.vlgmr.msra.gmra.mxu1 %v1195_v12  ;;  %875 = vmatpush.bf16.msrb.mxu0 %v1237_v32  ;;  %v824_v12 = vrot.slane %v822_v10, 1  ;;  %v570_v32 = vunpack.c.h.b16 %v556_v22  ;;  %vm581_vm14 = vcmp.ne.s32.totalorder %v577_v35, %v565_v28 }
  0x44   : > { %vm566_vm8 = vcmp.ne.s32.totalorder %v562_v24, %v564_v27  ;;  %vm573_vm11 = vcmp.ne.s32.totalorder %v569_v31, %v564_v27  ;;  %vm580_vm13 = vcmp.ne.s32.totalorder %v576_v33, %v564_v27 }
  0x45   : > { %768 = vmatpush.bf16.msra.mxu3 %v1213_v59  ;;  %v825_v17 = vsel %vm373_vm0, %v820_v11, %v824_v12  ;;  %vm568_vm10 = vmpackc.low %vm567_vm9, %vm566_vm8  ;;  %vm574_vm12 = vcmp.ne.s32.totalorder %v570_v32, %v565_v28 }
  0x46   : > { %vm575_vm15 = vmpackc.low %vm574_vm12, %vm573_vm11 }
  0x47   : > { %876 = vmatpush.bf16.msrb.mxu0 %v1236_v36  ;;  %v524_v36 = vld [vmem:[#allocation2 + $0x4] sm:$0x8]  ;;  %vm582_vm0 = vmpackc.low %vm581_vm14, %vm580_vm13 }
  0x48   : > { %v583_v37 = vsel %vm568_vm10, %v524_v36, 0 }
  0x49   : > { %v689_v41 = vunpack.c.l.b16 %v583_v37 }
  0x4b   : > { %877 = vmatpush.bf16.msrb.mxu0 %v1235_v40 }
  0x4f   : > { %878 = vmatpush.bf16.msrb.mxu0 %v1234_v43 }
  0x53   : > { %879 = vmatpush.bf16.msrb.mxu0 %v1233_v46 }
  0x57   : > { %880 = vmatpush.bf16.msrb.mxu0 %v1232_v50 }
  0x5b   : > { %881 = vmatpush.bf16.msrb.mxu0 %v1231_v55 }
  0x5f   : > { %882 = vmatpush.bf16.msrb.mxu0 %v1230_v2 }
  0x62   : > { %883 = vmatmul.bf16.vlgmr.msrb.gmra.mxu0 %v825_v17 }
  0xbf   : > { %v444_v0 = vpop.f32.mrf.mxu0 }
  0xc0   : > { %v507_v1 = vpop.f32.mrf.mxu1 }
  0xc1   : > { %v508_v13 = vadd.f32 %v507_v1, %v444_v0  ;;  %v1328_v0 = vld [vmem:[%s1687_s6] ss:$0 sm:$0xff] }
  0xc3   : > { %v516_v20 = vadd.f32 %v1327_v14, %v508_v13 }
  0xc5   : > { %v518_v29 = vmax.f32 %v516_v20, 0.0 }
  0xc7   : > { %v446_v18 = vpop.f32.mrf.mxu0 }
  0xc8   : > { %v509_v19 = vpop.f32.mrf.mxu1 }
  0xc9   : > { %v510_v21 = vadd.f32 %v509_v19, %v446_v18 }
  0xcb   : > { %v517_v25 = vadd.f32 %v1327_v14, %v510_v21 }
  0xcd   : > { %v519_v30 = vmax.f32 %v517_v25, 0.0 }
  0xcf   : > { %v1242_v34 = vpack.c.bf16 %v519_v30, %v518_v29 }
  0xd1   : > { %1249 = vst [vmem:[#allocation2 + $0x8] sm:$0xff] %v1242_v34  }
  0xd8   : > { %v1212_v38 = vld [vmem:[#allocation2 + $0x8] sm:$0xff] }
  0xd9   : > { %v525_v39 = vld [vmem:[#allocation2 + $0x8] sm:$0xf]  ;;  %v526_v40 = vld [vmem:[#allocation2 + $0xc] sm:$0xf]  ;;  %680 = vmatmul.bf16.vlgmr.msra.gmra.mxu2 %v1212_v38 }
  0xda   : > { %v584_v42 = vsel %vm575_vm15, %v525_v39, 0  ;;  %v585_v43 = vsel %vm582_vm0, %v526_v40, 0 }
  0xdb   : > { %v690_v44 = vunpack.c.l.b16 %v584_v42  ;;  %v691_v45 = vunpack.c.l.b16 %v585_v43 }
  0xdd   : > { %v692_v46 = vpack.c.b16 %v690_v44, %v689_v41  ;;  %v693_v47 = vpack.c.b16 %v691_v45, %v691_v45 }
  0xdf   : > { %v696_v48 = vshrl.u32 %v692_v46, 16  ;;  %v699_v49 = vshll.u32 %v692_v46, 16  ;;  %v704_v50 = vshrl.u32 %v693_v47, 16  ;;  %v707_v51 = vshll.u32 %v693_v47, 16  ;;  %v884_v60 = vpop.f32.mrf.mxu0 }
  0xe0   : > { %v885_v4 = vadd.f32 %v1328_v0, %v884_v60 }
  0xe1   : > { %v698_v52 = vrot.slane %v696_v48, 3  ;;  %v701_v53 = vrot.slane %v699_v49, 4  ;;  %v706_v54 = vrot.slane %v704_v50, 3  ;;  %v709_v55 = vrot.slane %v707_v51, 4 }
  0xe3   : > { %v702_v56 = vor.u32 %v701_v53, %v698_v52  ;;  %v710_v57 = vor.u32 %v709_v55, %v706_v54 }
  0xe5   : > { %v711_v58 = vsel %vm694_vm1, %v702_v56, %v710_v57 }
  0xe6   : > { %769 = vmatmul.bf16.vlgmr.msra.gmra.mxu3 %v711_v58 }
  0xe7   : > { %v886_v7 = vpop.f32.mrf.mxu0 }
  0xe8   : > { %v887_v10 = vadd.f32 %v1328_v0, %v886_v7 }
 0x15c   : > { %v681_v59 = vpop.f32.mrf.mxu2 }
 0x164   : > { %v683_v2 = vpop.f32.mrf.mxu2 }
 0x169   : > { %v770_v61 = vpop.f32.mrf.mxu3 }
 0x16a   : > { %v771_v62 = vadd.f32 %v770_v61, %v681_v59 }
 0x16c   : > { %v779_v1 = vadd.f32 %v1329_v63, %v771_v62 }
 0x16e   : > { %v781_v5 = vmax.f32 %v779_v1, 0.0 }
 0x170   : > { %v889_v9 = vadd.f32 %v885_v4, %v781_v5 }
 0x171   : > { %v772_v3 = vpop.f32.mrf.mxu3 }
 0x172   : > { %v773_v6 = vadd.f32 %v772_v3, %v683_v2  ;;  %v891_v13 = vmax.f32 %v889_v9, 0.0 }
 0x174   : > { %v780_v8 = vadd.f32 %v1329_v63, %v773_v6 }
 0x176   : > { %v782_v11 = vmax.f32 %v780_v8, 0.0 }
 0x178   : > { %v890_v12 = vadd.f32 %v887_v10, %v782_v11 }
 0x17a   : > { %v892_v14 = vmax.f32 %v890_v12, 0.0 }
 0x17c   : > { %v1247_v15 = vpack.c.bf16 %v892_v14, %v891_v13 }
 0x17e   : > { %1248 = vst [vmem:[%s321_s16] sm:$0xff] %v1247_v15  }
 0x17f   : > { %1447 = shalt.err (!%p1444_p8)
}
 0x180   : > { %s1499_s14 = smov 64   ;;  %s1500_s17 = smov 4  }
 0x181   : > { %1263 = dma.vmem_to_hbm [thread:$0]  (%p1579_p5), %s911_s19, 128, %s913_s20, %s898_s28, %s1499_s14, %s1499_s14, %s1500_s17  }
 0x182 PF: > { %p1285_p9 = scmp.ge.s32.totalorder %s1490_s27, 2  ;;  %s927_s18 = sand.u32 1, %s1478_s24  }
 0x183   : > { %s928_s1 = scalar_lea.sflag [#allocation5], %s927_s18 }
 0x184   : > { %p1276_p10 = pnand %p1285_p9, %p1583_p6 }
 0x186   : > { %p1277_p11 = pneg %p1276_p10 }
 0x188   : > { %1473 = dma.done.wait (%p1277_p11), %s928_s1, 128  }
 0x189   : > { %1475 = vsyncadd (%p1277_p11), %s928_s1, 4294967168  ;;  %p19_p12 = scmp.ge.s32.totalorder %s1566_s30, 4   ;;  %s1695_s24 = smov %s1482_s25 }
 0x18a   : > { %s1696_s25 = smov %s1486_s26  ;;  %s1697_s26 = smov %s1577_s10 }
 0x18b   : > { %s1698_s27 = smov %s1566_s30  ;;  %21 = sbr.rel (!%p19_p12) target bundleno = 7 (0x7), region = 96 }
 0x190   :  { %934 = vsyncpa [#allocation4], 1 }
 0x191   :  { %936 = vsyncpa [#allocation4 + $0x1], 1 }
 0x192   :  { %937 = vsyncpa [#allocation7], 1 }
 0x193   :  { %938 = vsyncpa [#allocation5], 1 }
 0x194   :  { %940 = vsyncpa [#allocation5 + $0x1], 1 }

</bundles_post_ra>
